<compile_context>
chip_gen: v6e
topology: v6e:2x2x1
jax: 0.10.0
libtpu: 0.0.40
codegen_flags: <defaults>
</compile_context>

<pallas_src>
import jax
import jax.numpy as jnp
from jax import lax
from jax.experimental import pallas as pl
from jax.experimental.pallas import tpu as pltpu


def _new3_layer_kernel(taps_ref, x_ref, wflat_ref, bconv_ref, a1_ref, a2_ref,
                       w1_ref, b1_ref, ar1_ref, w2_ref, b2_ref, ar2_ref,
                       out_ref, new3_ref):
    f32 = jnp.float32

    # --- masked dilated 3x3 conv as one matmul over stacked taps -------------
    taps = taps_ref[...].astype(f32)                       # (T*C, HWt)
    acc = jnp.dot(wflat_ref[...], taps,
                  preferred_element_type=f32)              # (O, HWt)
    acc = acc + bconv_ref[...]                             # bias (O, 1)

    # PReLU_1 (per output channel)
    new3 = jnp.where(acc >= 0, acc, a1_ref[...] * acc)
    new3_ref[...] = new3.astype(new3_ref.dtype)

    # --- merge with x, PReLU_2 ------------------------------------------------
    merged = (new3 + x_ref[...].astype(f32)) * 0.5
    merged = jnp.where(merged >= 0, merged, a2_ref[...] * merged)

    # --- Residual_module: 1x1 conv -> PReLU -> 1x1 conv -> avg -> PReLU -------
    r = jnp.dot(w1_ref[...], merged, preferred_element_type=f32) + b1_ref[...]
    r = jnp.where(r >= 0, r, ar1_ref[...] * r)
    r = jnp.dot(w2_ref[...], r, preferred_element_type=f32) + b2_ref[...]
    out = (merged + r) * 0.5
    out = jnp.where(out >= 0, out, ar2_ref[...] * out)
    out_ref[...] = out.astype(out_ref.dtype)


def _full_spec(a):
    """Whole (small parameter) array as a single resident block every grid step."""
    zeros = (0,) * a.ndim
    return pl.BlockSpec(a.shape, lambda n, s, _z=zeros: _z)


def _choose_spatial_tile(HW, cap=4096):
    """Largest lane-dense (multiple-of-128) divisor of HW not exceeding `cap`.

    Falls back to the full HW (always legal: block dim == full array dim) when HW
    is small or has no suitable divisor.
    """
    if HW <= cap:
        return HW
    t = (cap // 128) * 128
    while t >= 128:
        if HW % t == 0:
            return t
        t -= 128
    return HW


def new3_layer_forward(x, output_new, params, *, dilated_value=3, blind=True):
    """x, output_new: (N, C, H, W). Returns (output, output_new3), both NCHW."""
    N, C, H, W = x.shape
    HW = H * W
    d = int(dilated_value)

    conv_w = params["conv_w"]                               # (O, C, 3, 3)
    O = conv_w.shape[0]

    # Active taps of the (possibly masked) 3x3 kernel.
    if blind:
        tap_pos = [(0, 0), (0, 2), (1, 1), (2, 0), (2, 2)]   # mask [[1,0,1],[0,1,0],[1,0,1]]
    else:
        tap_pos = [(ky, kx) for ky in range(3) for kx in range(3)]

    # Flatten the selected taps into a single (O, T*C) weight matrix.
    w_flat = jnp.concatenate([conv_w[:, :, ky, kx] for ky, kx in tap_pos],
                             axis=1).astype(jnp.float32)    # (O, T*C)

    # im2col for the selected taps (layout plumbing in XLA; FLOPs stay in-kernel).
    pad = jnp.pad(output_new, ((0, 0), (0, 0), (d, d), (d, d)))
    taps = jnp.concatenate(
        [pad[:, :, ky * d:ky * d + H, kx * d:kx * d + W].reshape(N, C, HW)
         for ky, kx in tap_pos],
        axis=1)                                              # (N, T*C, HW)
    TC = taps.shape[1]

    x2 = x.reshape(N, C, HW)

    # Lane-dense spatial tiling (keeps VMEM bounded for large images).
    tile = _choose_spatial_tile(HW)
    n_sp = HW // tile

    col = lambda v: v.reshape(-1, 1).astype(jnp.float32)     # per-channel params -> (K, 1)
    args = (taps, x2,
            w_flat, col(params["conv_b"]),
            col(params["alpha1"]), col(params["alpha2"]),
            params["w1"].astype(jnp.float32), col(params["b1"]), col(params["ar1"]),
            params["w2"].astype(jnp.float32), col(params["b2"]), col(params["ar2"]))

    in_specs = [
        pl.BlockSpec((None, TC, tile), lambda n, s: (n, 0, s)),  # stacked taps tile
        pl.BlockSpec((None, C, tile), lambda n, s: (n, 0, s)),   # x tile
    ] + [_full_spec(a) for a in args[2:]]                        # small parameter tensors

    out_shape = (jax.ShapeDtypeStruct((N, C, HW), x.dtype),      # output
                 jax.ShapeDtypeStruct((N, O, HW), x.dtype))      # output_new3
    out_specs = (pl.BlockSpec((None, C, tile), lambda n, s: (n, 0, s)),
                 pl.BlockSpec((None, O, tile), lambda n, s: (n, 0, s)))

    out2, new3_2 = pl.pallas_call(
        _new3_layer_kernel,
        grid=(N, n_sp),
        in_specs=in_specs,
        out_specs=out_specs,
        out_shape=out_shape,
        compiler_params=pltpu.CompilerParams(
            # batch and spatial tiles are fully independent
            dimension_semantics=("parallel", "parallel")),
    )(*args)

    return out2.reshape(N, C, H, W), new3_2.reshape(N, O, H, W)


def _reference(x, output_new, params, d, blind):
    """Pure-JAX reference (mirrors the PyTorch module) for correctness checking."""
    w = params["conv_w"]
    if blind:
        m = jnp.array([[1., 0., 1.], [0., 1., 0.], [1., 0., 1.]], jnp.float32)
        w = w * m[None, None, :, :]
    y = lax.conv_general_dilated(
        output_new, w, window_strides=(1, 1), padding=((d, d), (d, d)),
        rhs_dilation=(d, d), dimension_numbers=("NCHW", "OIHW", "NCHW"),
        precision=lax.Precision.HIGHEST)
    y = y + params["conv_b"][None, :, None, None]

    prelu = lambda z, a: jnp.where(z >= 0, z, a[None, :, None, None] * z)
    new3 = prelu(y, params["alpha1"])
    merged = prelu((new3 + x) * 0.5, params["alpha2"])
    r = jnp.einsum("oc,nchw->nohw", params["w1"], merged,
                   precision=lax.Precision.HIGHEST) + params["b1"][None, :, None, None]
    r = prelu(r, params["ar1"])
    r = jnp.einsum("oc,nchw->nohw", params["w2"], r,
                   precision=lax.Precision.HIGHEST) + params["b2"][None, :, None, None]
    out = prelu((merged + r) * 0.5, params["ar2"])
    return out, new3


if __name__ == "__main__":
    import numpy as np

    key = jax.random.PRNGKey(0)
    N, C, H, W = 2, 4, 16, 16
    dilated_value = 3
    mul = 2
    Cm = C * mul

    ks = jax.random.split(key, 12)
    x = jax.random.normal(ks[0], (N, C, H, W), jnp.float32)
    output_new = jax.random.normal(ks[1], (N, C, H, W), jnp.float32)
    params = {
        "conv_w": 0.2 * jax.random.normal(ks[2], (C, C, 3, 3), jnp.float32),
        "conv_b": 0.1 * jax.random.normal(ks[3], (C,), jnp.float32),
        "alpha1": 0.25 * jax.random.uniform(ks[4], (C,), jnp.float32),
        "alpha2": 0.25 * jax.random.uniform(ks[5], (C,), jnp.float32),
        "w1": 0.2 * jax.random.normal(ks[6], (Cm, C), jnp.float32),
        "b1": 0.1 * jax.random.normal(ks[7], (Cm,), jnp.float32),
        "ar1": 0.25 * jax.random.uniform(ks[8], (Cm,), jnp.float32),
        "w2": 0.2 * jax.random.normal(ks[9], (C, Cm), jnp.float32),
        "b2": 0.1 * jax.random.normal(ks[10], (C,), jnp.float32),
        "ar2": 0.25 * jax.random.uniform(ks[11], (C,), jnp.float32),
    }

    out, new3 = new3_layer_forward(x, output_new, params,
                                   dilated_value=dilated_value, blind=True)
    jax.block_until_ready((out, new3))

    ref_out, ref_new3 = _reference(x, output_new, params, dilated_value, True)
    np.testing.assert_allclose(np.asarray(new3), np.asarray(ref_new3),
                               rtol=2e-2, atol=2e-2)
    np.testing.assert_allclose(np.asarray(out), np.asarray(ref_out),
                               rtol=2e-2, atol=2e-2)

    print("KERNEL_OK")
</pallas_src>

<mosaic_0001>
module attributes {stable_mosaic.version = 11 : i64} {
  func.func @_new3_layer_kernel(%arg0: i32, %arg1: i32, %arg2: memref<1x20x256xf32, #tpu.memory_space<vmem>>, %arg3: memref<1x4x256xf32, #tpu.memory_space<vmem>>, %arg4: memref<4x20xf32, #tpu.memory_space<vmem>>, %arg5: memref<4x1xf32, #tpu.memory_space<vmem>>, %arg6: memref<4x1xf32, #tpu.memory_space<vmem>>, %arg7: memref<4x1xf32, #tpu.memory_space<vmem>>, %arg8: memref<8x4xf32, #tpu.memory_space<vmem>>, %arg9: memref<8x1xf32, #tpu.memory_space<vmem>>, %arg10: memref<8x1xf32, #tpu.memory_space<vmem>>, %arg11: memref<4x8xf32, #tpu.memory_space<vmem>>, %arg12: memref<4x1xf32, #tpu.memory_space<vmem>>, %arg13: memref<4x1xf32, #tpu.memory_space<vmem>>, %arg14: memref<1x4x256xf32, #tpu.memory_space<vmem>>, %arg15: memref<1x4x256xf32, #tpu.memory_space<vmem>>) attributes {dimension_semantics = [#tpu.dimension_semantics<parallel>, #tpu.dimension_semantics<parallel>], iteration_bounds = array<i64: 2, 1>, scalar_prefetch = 0 : i64, scratch_operands = 0 : i64, tpu.core_type = #tpu.core_type<tc>, window_params = [{transform_indices = @transform_0, window_bounds = array<i64: 1, 20, 256>}, {transform_indices = @transform_1, window_bounds = array<i64: 1, 4, 256>}, {pipeline_mode = #tpu.pipeline_mode<synchronous>, transform_indices = @transform_2, window_bounds = array<i64: 4, 20>}, {pipeline_mode = #tpu.pipeline_mode<synchronous>, transform_indices = @transform_3, window_bounds = array<i64: 4, 1>}, {pipeline_mode = #tpu.pipeline_mode<synchronous>, transform_indices = @transform_4, window_bounds = array<i64: 4, 1>}, {pipeline_mode = #tpu.pipeline_mode<synchronous>, transform_indices = @transform_5, window_bounds = array<i64: 4, 1>}, {pipeline_mode = #tpu.pipeline_mode<synchronous>, transform_indices = @transform_6, window_bounds = array<i64: 8, 4>}, {pipeline_mode = #tpu.pipeline_mode<synchronous>, transform_indices = @transform_7, window_bounds = array<i64: 8, 1>}, {pipeline_mode = #tpu.pipeline_mode<synchronous>, transform_indices = @transform_8, window_bounds = array<i64: 8, 1>}, {pipeline_mode = #tpu.pipeline_mode<synchronous>, transform_indices = @transform_9, window_bounds = array<i64: 4, 8>}, {pipeline_mode = #tpu.pipeline_mode<synchronous>, transform_indices = @transform_10, window_bounds = array<i64: 4, 1>}, {pipeline_mode = #tpu.pipeline_mode<synchronous>, transform_indices = @transform_11, window_bounds = array<i64: 4, 1>}, {transform_indices = @transform_12, window_bounds = array<i64: 1, 4, 256>}, {transform_indices = @transform_13, window_bounds = array<i64: 1, 4, 256>}]} {
    %c0 = arith.constant 0 : index
    %c0_0 = arith.constant 0 : index
    %c0_1 = arith.constant 0 : index
    %0 = vector.load %arg2[%c0, %c0_0, %c0_1] : memref<1x20x256xf32, #tpu.memory_space<vmem>>, vector<1x20x256xf32>
    %1 = vector.shape_cast %0 : vector<1x20x256xf32> to vector<20x256xf32>
    %c0_2 = arith.constant 0 : index
    %c0_3 = arith.constant 0 : index
    %2 = vector.load %arg4[%c0_2, %c0_3] : memref<4x20xf32, #tpu.memory_space<vmem>>, vector<4x20xf32>
    %cst = arith.constant dense<0.000000e+00> : vector<4x256xf32>
    %3 = tpu.matmul %2, %1, %cst {dimension_numbers = #tpu.dot_dimension_numbers<[1], [0], [0], [1], [0, 0, 1, 1], [], []>} : vector<4x20xf32>, vector<20x256xf32>, vector<4x256xf32> -> vector<4x256xf32>
    %c0_4 = arith.constant 0 : index
    %c0_5 = arith.constant 0 : index
    %4 = vector.load %arg5[%c0_4, %c0_5] : memref<4x1xf32, #tpu.memory_space<vmem>>, vector<4x1xf32>
    %5 = vector.broadcast %4 : vector<4x1xf32> to vector<4x256xf32>
    %6 = arith.addf %3, %5 : vector<4x256xf32>
    %cst_6 = arith.constant 0.000000e+00 : f32
    %7 = vector.broadcast %cst_6 : f32 to vector<4x256xf32>
    %8 = arith.cmpf oge, %6, %7 : vector<4x256xf32>
    %c0_7 = arith.constant 0 : index
    %c0_8 = arith.constant 0 : index
    %9 = vector.load %arg6[%c0_7, %c0_8] : memref<4x1xf32, #tpu.memory_space<vmem>>, vector<4x1xf32>
    %10 = vector.broadcast %9 : vector<4x1xf32> to vector<4x256xf32>
    %11 = arith.mulf %10, %6 : vector<4x256xf32>
    %12 = arith.select %8, %6, %11 : vector<4x256xi1>, vector<4x256xf32>
    %c0_9 = arith.constant 0 : index
    %c0_10 = arith.constant 0 : index
    %c0_11 = arith.constant 0 : index
    %13 = vector.load %arg15[%c0_9, %c0_10, %c0_11] : memref<1x4x256xf32, #tpu.memory_space<vmem>>, vector<1x4x256xf32>
    %14 = vector.shape_cast %13 : vector<1x4x256xf32> to vector<4x256xf32>
    %15 = vector.shape_cast %12 : vector<4x256xf32> to vector<1x4x256xf32>
    tpu.vector_store %arg15[%c0_9, %c0_10, %c0_11], %15 {strides = array<i32>} : memref<1x4x256xf32, #tpu.memory_space<vmem>>, vector<1x4x256xf32>,
    %c0_12 = arith.constant 0 : index
    %c0_13 = arith.constant 0 : index
    %c0_14 = arith.constant 0 : index
    %16 = vector.load %arg3[%c0_12, %c0_13, %c0_14] : memref<1x4x256xf32, #tpu.memory_space<vmem>>, vector<1x4x256xf32>
    %17 = vector.shape_cast %16 : vector<1x4x256xf32> to vector<4x256xf32>
    %18 = arith.addf %12, %17 : vector<4x256xf32>
    %cst_15 = arith.constant 5.000000e-01 : f32
    %19 = vector.broadcast %cst_15 : f32 to vector<4x256xf32>
    %20 = arith.mulf %18, %19 : vector<4x256xf32>
    %cst_16 = arith.constant 0.000000e+00 : f32
    %21 = vector.broadcast %cst_16 : f32 to vector<4x256xf32>
    %22 = arith.cmpf oge, %20, %21 : vector<4x256xf32>
    %c0_17 = arith.constant 0 : index
    %c0_18 = arith.constant 0 : index
    %23 = vector.load %arg7[%c0_17, %c0_18] : memref<4x1xf32, #tpu.memory_space<vmem>>, vector<4x1xf32>
    %24 = vector.broadcast %23 : vector<4x1xf32> to vector<4x256xf32>
    %25 = arith.mulf %24, %20 : vector<4x256xf32>
    %26 = arith.select %22, %20, %25 : vector<4x256xi1>, vector<4x256xf32>
    %c0_19 = arith.constant 0 : index
    %c0_20 = arith.constant 0 : index
    %27 = vector.load %arg8[%c0_19, %c0_20] : memref<8x4xf32, #tpu.memory_space<vmem>>, vector<8x4xf32>
    %cst_21 = arith.constant dense<0.000000e+00> : vector<8x256xf32>
    %28 = tpu.matmul %27, %26, %cst_21 {dimension_numbers = #tpu.dot_dimension_numbers<[1], [0], [0], [1], [0, 0, 1, 1], [], []>} : vector<8x4xf32>, vector<4x256xf32>, vector<8x256xf32> -> vector<8x256xf32>
    %c0_22 = arith.constant 0 : index
    %c0_23 = arith.constant 0 : index
    %29 = vector.load %arg9[%c0_22, %c0_23] : memref<8x1xf32, #tpu.memory_space<vmem>>, vector<8x1xf32>
    %30 = vector.broadcast %29 : vector<8x1xf32> to vector<8x256xf32>
    %31 = arith.addf %28, %30 : vector<8x256xf32>
    %cst_24 = arith.constant 0.000000e+00 : f32
    %32 = vector.broadcast %cst_24 : f32 to vector<8x256xf32>
    %33 = arith.cmpf oge, %31, %32 : vector<8x256xf32>
    %c0_25 = arith.constant 0 : index
    %c0_26 = arith.constant 0 : index
    %34 = vector.load %arg10[%c0_25, %c0_26] : memref<8x1xf32, #tpu.memory_space<vmem>>, vector<8x1xf32>
    %35 = vector.broadcast %34 : vector<8x1xf32> to vector<8x256xf32>
    %36 = arith.mulf %35, %31 : vector<8x256xf32>
    %37 = arith.select %33, %31, %36 : vector<8x256xi1>, vector<8x256xf32>
    %c0_27 = arith.constant 0 : index
    %c0_28 = arith.constant 0 : index
    %38 = vector.load %arg11[%c0_27, %c0_28] : memref<4x8xf32, #tpu.memory_space<vmem>>, vector<4x8xf32>
    %cst_29 = arith.constant dense<0.000000e+00> : vector<4x256xf32>
    %39 = tpu.matmul %38, %37, %cst_29 {dimension_numbers = #tpu.dot_dimension_numbers<[1], [0], [0], [1], [0, 0, 1, 1], [], []>} : vector<4x8xf32>, vector<8x256xf32>, vector<4x256xf32> -> vector<4x256xf32>
    %c0_30 = arith.constant 0 : index
    %c0_31 = arith.constant 0 : index
    %40 = vector.load %arg12[%c0_30, %c0_31] : memref<4x1xf32, #tpu.memory_space<vmem>>, vector<4x1xf32>
    %41 = vector.broadcast %40 : vector<4x1xf32> to vector<4x256xf32>
    %42 = arith.addf %39, %41 : vector<4x256xf32>
    %43 = arith.addf %26, %42 : vector<4x256xf32>
    %cst_32 = arith.constant 5.000000e-01 : f32
    %44 = vector.broadcast %cst_32 : f32 to vector<4x256xf32>
    %45 = arith.mulf %43, %44 : vector<4x256xf32>
    %cst_33 = arith.constant 0.000000e+00 : f32
    %46 = vector.broadcast %cst_33 : f32 to vector<4x256xf32>
    %47 = arith.cmpf oge, %45, %46 : vector<4x256xf32>
    %c0_34 = arith.constant 0 : index
    %c0_35 = arith.constant 0 : index
    %48 = vector.load %arg13[%c0_34, %c0_35] : memref<4x1xf32, #tpu.memory_space<vmem>>, vector<4x1xf32>
    %49 = vector.broadcast %48 : vector<4x1xf32> to vector<4x256xf32>
    %50 = arith.mulf %49, %45 : vector<4x256xf32>
    %51 = arith.select %47, %45, %50 : vector<4x256xi1>, vector<4x256xf32>
    %c0_36 = arith.constant 0 : index
    %c0_37 = arith.constant 0 : index
    %c0_38 = arith.constant 0 : index
    %52 = vector.load %arg14[%c0_36, %c0_37, %c0_38] : memref<1x4x256xf32, #tpu.memory_space<vmem>>, vector<1x4x256xf32>
    %53 = vector.shape_cast %52 : vector<1x4x256xf32> to vector<4x256xf32>
    %54 = vector.shape_cast %51 : vector<4x256xf32> to vector<1x4x256xf32>
    tpu.vector_store %arg14[%c0_36, %c0_37, %c0_38], %54 {strides = array<i32>} : memref<1x4x256xf32, #tpu.memory_space<vmem>>, vector<1x4x256xf32>,
    return
  }
  func.func @transform_0(%arg0: i32, %arg1: i32) -> (i32, i32, i32) {
    %c0_i32 = arith.constant 0 : i32
    %c0_i32_0 = arith.constant 0 : i32
    return %arg0, %c0_i32, %arg1 : i32, i32, i32
  }
  func.func @transform_1(%arg0: i32, %arg1: i32) -> (i32, i32, i32) {
    %c0_i32 = arith.constant 0 : i32
    %c0_i32_0 = arith.constant 0 : i32
    return %arg0, %c0_i32, %arg1 : i32, i32, i32
  }
  func.func @transform_2(%arg0: i32, %arg1: i32) -> (i32, i32) {
    %c0_i32 = arith.constant 0 : i32
    %c0_i32_0 = arith.constant 0 : i32
    %c0_i32_1 = arith.constant 0 : i32
    return %c0_i32, %c0_i32_0 : i32, i32
  }
  func.func @transform_3(%arg0: i32, %arg1: i32) -> (i32, i32) {
    %c0_i32 = arith.constant 0 : i32
    %c0_i32_0 = arith.constant 0 : i32
    %c0_i32_1 = arith.constant 0 : i32
    return %c0_i32, %c0_i32_0 : i32, i32
  }
  func.func @transform_4(%arg0: i32, %arg1: i32) -> (i32, i32) {
    %c0_i32 = arith.constant 0 : i32
    %c0_i32_0 = arith.constant 0 : i32
    %c0_i32_1 = arith.constant 0 : i32
    return %c0_i32, %c0_i32_0 : i32, i32
  }
  func.func @transform_5(%arg0: i32, %arg1: i32) -> (i32, i32) {
    %c0_i32 = arith.constant 0 : i32
    %c0_i32_0 = arith.constant 0 : i32
    %c0_i32_1 = arith.constant 0 : i32
    return %c0_i32, %c0_i32_0 : i32, i32
  }
  func.func @transform_6(%arg0: i32, %arg1: i32) -> (i32, i32) {
    %c0_i32 = arith.constant 0 : i32
    %c0_i32_0 = arith.constant 0 : i32
    %c0_i32_1 = arith.constant 0 : i32
    return %c0_i32, %c0_i32_0 : i32, i32
  }
  func.func @transform_7(%arg0: i32, %arg1: i32) -> (i32, i32) {
    %c0_i32 = arith.constant 0 : i32
    %c0_i32_0 = arith.constant 0 : i32
    %c0_i32_1 = arith.constant 0 : i32
    return %c0_i32, %c0_i32_0 : i32, i32
  }
  func.func @transform_8(%arg0: i32, %arg1: i32) -> (i32, i32) {
    %c0_i32 = arith.constant 0 : i32
    %c0_i32_0 = arith.constant 0 : i32
    %c0_i32_1 = arith.constant 0 : i32
    return %c0_i32, %c0_i32_0 : i32, i32
  }
  func.func @transform_9(%arg0: i32, %arg1: i32) -> (i32, i32) {
    %c0_i32 = arith.constant 0 : i32
    %c0_i32_0 = arith.constant 0 : i32
    %c0_i32_1 = arith.constant 0 : i32
    return %c0_i32, %c0_i32_0 : i32, i32
  }
  func.func @transform_10(%arg0: i32, %arg1: i32) -> (i32, i32) {
    %c0_i32 = arith.constant 0 : i32
    %c0_i32_0 = arith.constant 0 : i32
    %c0_i32_1 = arith.constant 0 : i32
    return %c0_i32, %c0_i32_0 : i32, i32
  }
  func.func @transform_11(%arg0: i32, %arg1: i32) -> (i32, i32) {
    %c0_i32 = arith.constant 0 : i32
    %c0_i32_0 = arith.constant 0 : i32
    %c0_i32_1 = arith.constant 0 : i32
    return %c0_i32, %c0_i32_0 : i32, i32
  }
  func.func @transform_12(%arg0: i32, %arg1: i32) -> (i32, i32, i32) {
    %c0_i32 = arith.constant 0 : i32
    %c0_i32_0 = arith.constant 0 : i32
    return %arg0, %c0_i32, %arg1 : i32, i32, i32
  }
  func.func @transform_13(%arg0: i32, %arg1: i32) -> (i32, i32, i32) {
    %c0_i32 = arith.constant 0 : i32
    %c0_i32_0 = arith.constant 0 : i32
    return %arg0, %c0_i32, %arg1 : i32, i32, i32
  }
}

</mosaic_0001>

<bundles_post_ra>
// kernel: tpu_custom_call.1
= control target key start
LH: loop header
LB: loop body
LE: loop exit
PB: predicated region body
PF: predicated region fallthrough
CT: control target
= control target key end

     0   :  { %s1473_s0 = inlined_call_operand.vmem [shape: f32[2,20,256], index: 0, kind: input, shape index: {}]   ;;  %s1474_s1 = inlined_call_operand.vmem [shape: f32[2,4,256], index: 1, kind: input, shape index: {}]   ;;  %s1475_s2 = inlined_call_operand.vmem [shape: f32[4,20], index: 2, kind: input, shape index: {}]   ;;  %s1476_s3 = inlined_call_operand.vmem [shape: f32[4,1], index: 3, kind: input, shape index: {}]   ;;  %s1477_s4 = inlined_call_operand.vmem [shape: f32[4,1], index: 4, kind: input, shape index: {}]   ;;  %s1478_s5 = inlined_call_operand.vmem [shape: f32[4,1], index: 5, kind: input, shape index: {}]   ;;  %s1479_s6 = inlined_call_operand.vmem [shape: f32[8,4], index: 6, kind: input, shape index: {}]   ;;  %s1480_s7 = inlined_call_operand.vmem [shape: f32[8,1], index: 7, kind: input, shape index: {}]   ;;  %s1481_s8 = inlined_call_operand.vmem [shape: f32[8,1], index: 8, kind: input, shape index: {}]   ;;  %s1482_s9 = inlined_call_operand.vmem [shape: f32[4,8], index: 9, kind: input, shape index: {}]   ;;  %s1483_s10 = inlined_call_operand.vmem [shape: f32[4,1], index: 10, kind: input, shape index: {}]   ;;  %s1484_s11 = inlined_call_operand.vmem [shape: f32[4,1], index: 11, kind: input, shape index: {}]   ;;  %s1485_s12 = inlined_call_operand.hbm [shape: f32[2,4,256], index: 12, kind: output, shape index: {0}]   ;;  %s1486_s13 = inlined_call_operand.hbm [shape: f32[2,4,256], index: 13, kind: output, shape index: {1}]  }
   0x1   :  { %1491 = sst [smem:[#allocation11_spill]] %s1473_s0 }
   0x2   :  { %1492 = sst [smem:[#allocation12_spill]] %s1474_s1 }
   0x3   :  { %1493 = sst [smem:[#allocation13_spill]] %s1475_s2 }
   0x4   :  { %1494 = sst [smem:[#allocation14_spill]] %s1476_s3 }
   0x5   :  { %19 = vsyncpa [#allocation3], 0 }
   0x6   :  { %21 = vsyncpa [#allocation3 + $0x1], 0 }
   0x7   :  { %22 = vsyncpa [#allocation5], 0 }
   0x8   :  { %24 = vsyncpa [#allocation5 + $0x1], 0  ;;  %s1298_s25 = smov 0   ;;  %s1300_s26 = smov 0  }
   0x9   :  { %s1302_s27 = smov 0   ;;  %s1304_s28 = smov 0  }
   0xa   :  { %s1306_s29 = smov 0   ;;  %s1308_s30 = smov 0  }
   0xb LB: > { %1495 = sst [smem:[#allocation8_spill]] %s1218_s29  ;;  %s1022_s14 = sadd.s32 4294967295, %s1222_s30   ;;  %s1222_s30 = sphi %s1308_s30, %s30_s30   ;;  %s1218_s29 = sphi %s1306_s29, %s1508_s29   ;;  %s1214_s28 = sphi %s1304_s28, %s1507_s28   ;;  %s1210_s27 = sphi %s1302_s27, %s1511_s27   ;;  %s1206_s26 = sphi %s1300_s26, %s1510_s26   ;;  %s1202_s25 = sphi %s1298_s25, %s1509_s25  }
   0xc   : > { %s1023_s15 = sadd.s32 4294967294, %s1222_s30   ;;  %s42_s16 = sadd.s32 1, %s1218_s29 }
   0xd   : > { %s317_s17 = sadd.s32 1, %s1210_s27  ;;  %p44_p0 = scmp.ge.s32.totalorder %s42_s16, 2 }
   0xe   : > { %p327_p1 = scmp.ne.s32.totalorder %s1210_s27, %s1206_s26  ;;  %p328_p2 = scmp.eq.s32.totalorder %s1022_s14, 1 }
   0xf   : > { %p333_p3 = scmp.ne.s32.totalorder %s1206_s26, %s1202_s25  ;;  %s1513_s16 = smov (%p44_p0, %s42_s16), 0 }
  0x10   : > { %1496 = sst [smem:[#allocation9_spill]] %s1513_s16  ;;  %p1338_p4 = por %p328_p2, %p327_p1 }
  0x11   : > { %p334_p5 = scmp.eq.s32.totalorder %s1023_s15, 1  ;;  %s312_s19 = ssub.s32 %s1218_s29, %s1513_s16 }
  0x12   : > { %p1026_p6 = scmp.ge.s32.totalorder %s1222_s30, 1  ;;  %p315_p7 = scmp.eq.s32.totalorder %s312_s19, 0 }
  0x13   : > { %p1345_p8 = por %p334_p5, %p333_p3  ;;  %p436_p9 = scmp.lt.s32.totalorder %s1222_s30, 3 }
  0x14   : > { %s1351_s21 = scalar_select %p315_p7, %s1210_s27, %s317_s17  }
  0x15   : > { %p437_p10 = pnand %p1026_p6, %p436_p9 }
  0x16   : > { %1499 = sst [smem:[#allocation10_spill]] %s1351_s21  ;;  %p499_p11 = scmp.lt.s32.totalorder (!%p437_p10), %s1214_s28, 1 }
  0x17   : > { %440 = sbr.rel (%p437_p10) target bundleno = 671 (0x29f), region = 68  ;;  %s1500_s3 = sld [smem:[#allocation14_spill]] (!%p437_p10) }
  0x18   : > { %s1501_s0 = sld [smem:[#allocation11_spill]] (!%p437_p10)  ;;  %s1394_s15 = sand.u32 (!%p437_p10), 1, %s1206_s26  }
  0x19   : > { %s1502_s2 = sld [smem:[#allocation13_spill]] (!%p437_p10)  ;;  %s1489_s19 = sshll.u32 (!%p437_p10), %s1394_s15, 3 }
  0x1a   : > { %s1503_s1 = sld [smem:[#allocation12_spill]] (!%p437_p10)  ;;  %s861_s29 = scalar_lea.sflag (!%p437_p10), [#allocation5], %s1394_s15 }
  0x1c   : > { %v1224_v0 = vmov 0.0   ;;  %s1360_s24 = scalar_select %p499_p11, %s1214_s28, 1  ;;  %v1225_v2 = vmov 0   ;;  %v642_v3 = vld [vmem:[%s1478_s5] sm:$0xf]  ;;  %vm537_vm0 = vcmask 1043456  }
  0x1d   : > { %608 = vmatprep.mubr.f32.mxu0 %v1224_v0  ;;  %v527_v1 = vld [vmem:[%s1500_s3] sm:$0xf]  ;;  %733 = vmatprep.mubr.f32.mxu1 %v1224_v0  ;;  %vm533_vm1 = vcmask 162816   ;;  %vm659_vm6 = vcmask 31744   ;;  %vm759_vm9 = vcmask 64512  }
  0x1e   : > { %1113 = vset.pattern.permute.xlu0 %v1225_v2  ;;  %1114 = vset.pattern.permute.xlu1 %v1225_v2  ;;  %s1050_s17 = smul.u32 48, %s1360_s24  ;;  %v617_v4 = vld [vmem:[%s1477_s4] sm:$0xf]  ;;  %s1047_s23 = sshll.u32 %s1360_s24, 3 }
  0x1f   : > { %530 = vperm.xlu0 %1113, %v527_v1   ;;  %645 = vperm.xlu1 %1114, %v642_v3   ;;  %v653_v5 = vld [vmem:[%s1480_s7] sm:$0xff]  ;;  %s1399_s24 = scalar_lea.vmem [#allocation4], %s1489_s19 }
  0x20   : > { %s506_s21 = scalar_lea.vmem %s1501_s0, %s1050_s17  ;;  %v742_v10 = vld [vmem:[%s1481_s8] sm:$0xff]  ;;  %s516_s16 = scalar_lea.vmem %s1503_s1, %s1047_s23 }
  0x21   : > { %v525_v6 = vld [vmem:[%s506_s21 + $0x28] sm:$0xf]  ;;  %v524_v7 = vld [vmem:[%s506_s21 + $0x20] sm:$0xf]  ;;  %v523_v8 = vld [vmem:[%s506_s21 + $0x18] sm:$0xff]  ;;  %s1490_s23 = sshll.u32 %s1214_s28, 7 }
  0x22   : > { %1032 = vmatprep.subr.msk.mxu0 %vm537_vm0, %v525_v6  ;;  %v522_v9 = vld [vmem:[%s506_s21 + $0x10] sm:$0xff]  ;;  %v521_v11 = vld [vmem:[%s506_s21 + $0x8] sm:$0xff]  ;;  %v753_v12 = vld [vmem:[%s1483_s10] sm:$0xf]  ;;  %s893_s3 = sshll.u32 %s1399_s24, 4  ;;  %s1226_s17 = smov [#allocation4]   ;;  %s894_s3 = int_to_ptr.vmem [resolvable:$true] %s893_s3 }
  0x23   : > { %620 = vperm.xlu0 %1113, %v617_v4   ;;  %656 = vperm.xlu1 %1114, %v653_v5   ;;  %v520_v13 = vld [vmem:[%s506_s21] sm:$0xff]  ;;  %s1116_s19 = scalar_lea.vmem %s894_s3, 128  ;;  %s1120_s22 = sshll.u32 %s1226_s17, 4  ;;  %s1121_s22 = int_to_ptr.vmem [resolvable:$false] %s1120_s22 }
  0x24   : > { %1033 = vmatpush1.msk.msra.mxu0 %vm537_vm0, %v524_v7  ;;  %v526_v14 = vld [vmem:[%s1502_s2] sm:$0xf]  ;;  %p1117_p12 = scmp.ne.s32.totalorder %s894_s3, %s1116_s19  ;;  %s1122_s0 = scalar_lea.vmem %s1121_s22, 256 }
  0x25   : > { %572 = vmatprep.subr.mxu0 %v523_v8  ;;  %v840_v15 = vld [vmem:[%s1484_s11] sm:$0xf]  ;;  %p1123_p1 = scmp.lt.s32.totalorder %s894_s3, %s1121_s22  ;;  %p1124_p2 = scmp.lt.s32.totalorder %s1122_s0, %s1116_s19 }
  0x26   : > { %573 = vmatpush1.msra.mxu0 %v522_v9  ;;  %v632_v19 = vld [vmem:[%s516_s16] sm:$0xff]  ;;  %s891_s16 = scalar_lea.hbm %s1486_s13, %s1490_s23  ;;  %p1118_p13 = pnand %p1117_p12, %p1338_p4 }
  0x27   : > { %745 = vperm.xlu0 %1113, %v742_v10   ;;  %574 = vmatprep.subr.mxu0 %v521_v11  ;;  %v634_v24 = vcombine.high %v632_v19, %v632_v19  ;;  %v652_v37 = vld [vmem:[%s1479_s6] sm:$0xff]  ;;  %p1125_p3 = por %p1124_p2, %p1123_p1 }
  0x28   : > { %756 = vperm.xlu1 %1114, %v753_v12   ;;  %575 = vmatpush1.msra.mxu0 %v520_v13  ;;  %v752_v48 = vld [vmem:[%s1482_s9] sm:$0xf]  ;;  %p1119_p0 = pneg %p1118_p13 }
  0x29   : > { %1034 = vmatmul.mubr.msk.f32.vlgmr.msra.gmra.mxu0 %vm533_vm1, %v526_v14 }
  0x2a   : > { %p1126_p5 = pnand %p1125_p3, %p1119_p0 }
  0x2b   : > { %843 = vperm.xlu0 %1113, %v840_v15  }
  0x9a   : > { %v531_v16 = vpop.permute.xlu0 %530  ;;  %v646_v32 = vpop.permute.xlu1 %645 }
  0x9e   : > { %v621_v20 = vpop.permute.xlu0 %620  ;;  %v657_v39 = vpop.permute.xlu1 %656 }
  0xa2   : > { %v746_v43 = vpop.permute.xlu0 %745 }
  0xe9   : > { %v610_v17 = vpop.f32.mrf.mxu0 }
  0xea   : > { %v611_v18 = vadd.f32 %v610_v17, %v531_v16 }
  0xeb   : > { %v612_v21 = vpop.f32.mrf.mxu0 }
  0xec   : > { %vm615_vm2 = vcmp.ge.f32.partialorder %v611_v18, 0.0  ;;  %v623_v22 = vmul.f32 %v621_v20, %v611_v18  ;;  %v613_v23 = vadd.f32 %v612_v21, %v531_v16 }
  0xee   : > { %v625_v25 = vsel %vm615_vm2, %v611_v18, %v623_v22  ;;  %vm616_vm3 = vcmp.ge.f32.partialorder %v613_v23, 0.0  ;;  %v624_v26 = vmul.f32 %v621_v20, %v613_v23 }
  0xef   : > { %v636_v27 = vadd.f32 %v632_v19, %v625_v25 }
  0xf0   : > { %v626_v28 = vsel %vm616_vm3, %v613_v23, %v624_v26 }
  0xf1   : > { %v637_v29 = vadd.f32 %v634_v24, %v626_v28  ;;  %v638_v30 = vmul.f32 0.5, %v636_v27  ;;  %v629_v31 = vcombine.low %v625_v25, %v626_v28 }
  0xf3   : > { %v639_v33 = vmul.f32 0.5, %v637_v29  ;;  %631 = vst [vmem:[%s1399_s24] sm:$0xff] %v629_v31  ;;  %v648_v34 = vmul.f32 %v646_v32, %v638_v30  ;;  %vm640_vm5 = vcmp.ge.f32.partialorder %v638_v30, 0.0 }
  0xf5   : > { %v649_v35 = vmul.f32 %v646_v32, %v639_v33  ;;  %vm641_vm4 = vcmp.ge.f32.partialorder %v639_v33, 0.0  ;;  %v650_v38 = vsel %vm640_vm5, %v638_v30, %v648_v34 }
  0xf7   : > { %v651_v36 = vsel %vm641_vm4, %v639_v33, %v649_v35 }
  0xf8   : > { %1035 = vmatprep.subr.msk.mxu1 %vm537_vm0, %v651_v36 }
  0xf9   : > { %1036 = vmatpush1.msk.msra.mxu1 %vm537_vm0, %v650_v38 }
  0xfa   : > { %1037 = vmatmul.mubr.msk.f32.vlgmr.msra.gmra.mxu1 %vm659_vm6, %v652_v37 }
  0xfb   : > { %827 = vmatprep.mubr.f32.mxu1 %v1224_v0 }
 0x1ba   : > { %v735_v40 = vpop.f32.mrf.mxu1 }
 0x1bb   : > { %v736_v41 = vadd.f32 %v735_v40, %v657_v39 }
 0x1bc   : > { %v737_v42 = vpop.f32.mrf.mxu1 }
 0x1bd   : > { %v738_v44 = vadd.f32 %v737_v42, %v657_v39  ;;  %v748_v45 = vmul.f32 %v746_v43, %v736_v41  ;;  %vm740_vm7 = vcmp.ge.f32.partialorder %v736_v41, 0.0 }
 0x1bf   : > { %v749_v46 = vmul.f32 %v746_v43, %v738_v44  ;;  %vm741_vm8 = vcmp.ge.f32.partialorder %v738_v44, 0.0  ;;  %v750_v49 = vsel %vm740_vm7, %v736_v41, %v748_v45 }
 0x1c1   : > { %v751_v47 = vsel %vm741_vm8, %v738_v44, %v749_v46 }
 0x1c2   : > { %793 = vmatprep.subr.mxu1 %v751_v47 }
 0x1c3   : > { %794 = vmatpush1.msra.mxu1 %v750_v49 }
 0x1c4   : > { %1038 = vmatmul.mubr.msk.f32.vlgmr.msra.gmra.mxu1 %vm759_vm9, %v752_v48 }
 0x1c5   : > { %1129 = shalt.err (!%p1126_p5)
}
 0x1c6   : > { %s1130_s1 = scalar_lea.hbm %s891_s16, 128  ;;  %s1134_s14 = scalar_lea.hbm %s1486_s13, 256 }
 0x1c7   : > { %p1131_p6 = scmp.ne.s32.totalorder %s891_s16, %s1130_s1  ;;  %p1135_p10 = scmp.lt.s32.totalorder %s891_s16, %s1486_s13 }
 0x1c8   : > { %p1136_p11 = scmp.lt.s32.totalorder %s1134_s14, %s1130_s1 }
 0x1c9   : > { %p1132_p7 = pnand %p1131_p6, %p1338_p4 }
 0x1ca   : > { %p1137_p12 = por %p1136_p11, %p1135_p10 }
 0x1cb   : > { %p1133_p9 = pneg %p1132_p7 }
 0x1cd   : > { %p1138_p13 = pnand %p1137_p12, %p1133_p9 }
 0x1cf   : > { %1141 = shalt.err (!%p1138_p13)
}
 0x1d0   : > { %1052 = dma.vmem_to_hbm [thread:$0]  (%p1338_p4), %s894_s3, 128, %s891_s16, %s861_s29   ;;  %v757_v50 = vpop.permute.xlu1 %756  ;;  %v844_v58 = vpop.permute.xlu0 %843 }
 0x1d1   : > { %s1504_s0 = sshll.u32 %s1394_s15, 3  ;;  %s1505_s19 = sshll.u32 %s1214_s28, 7 }
 0x1d2   : > { %s490_s1 = scalar_lea.vmem [#allocation2], %s1504_s0  ;;  %s875_s3 = scalar_lea.hbm %s1485_s12, %s1505_s19 }
 0x1d3   : > { %s877_s2 = sshll.u32 %s490_s1, 4  ;;  %s856_s29 = scalar_lea.sflag [#allocation3], %s1394_s15  ;;  %s878_s2 = int_to_ptr.vmem [resolvable:$true] %s877_s2 }
 0x1d4   : > { %s1142_s17 = scalar_lea.vmem %s878_s2, 128  ;;  %s1227_s22 = smov [#allocation2]  }
 0x1d5   : > { %p1143_p0 = scmp.ne.s32.totalorder %s878_s2, %s1142_s17  ;;  %s1146_s24 = sshll.u32 %s1227_s22, 4  ;;  %s1147_s24 = int_to_ptr.vmem [resolvable:$false] %s1146_s24 }
 0x1d6   : > { %s1148_s21 = scalar_lea.vmem %s1147_s24, 256  ;;  %p1149_p3 = scmp.lt.s32.totalorder %s878_s2, %s1147_s24 }
 0x1d7   : > { %p1144_p1 = pnand %p1143_p0, %p1338_p4  ;;  %p1150_p5 = scmp.lt.s32.totalorder %s1148_s21, %s1142_s17 }
 0x1d9   : > { %p1145_p2 = pneg %p1144_p1  ;;  %p1151_p6 = por %p1150_p5, %p1149_p3 }
 0x1db   : > { %p1152_p7 = pnand %p1151_p6, %p1145_p2 }
 0x284   : > { %v829_v51 = vpop.f32.mrf.mxu1 }
 0x285   : > { %v830_v52 = vadd.f32 %v829_v51, %v757_v50 }
 0x286   : > { %v831_v53 = vpop.f32.mrf.mxu1 }
 0x287   : > { %v834_v54 = vadd.f32 %v830_v52, %v650_v38  ;;  %v832_v55 = vadd.f32 %v831_v53, %v757_v50 }
 0x289   : > { %v836_v56 = vmul.f32 0.5, %v834_v54  ;;  %v835_v57 = vadd.f32 %v832_v55, %v651_v36 }
 0x28b   : > { %v846_v59 = vmul.f32 %v844_v58, %v836_v56  ;;  %v837_v60 = vmul.f32 0.5, %v835_v57  ;;  %vm838_vm10 = vcmp.ge.f32.partialorder %v836_v56, 0.0 }
 0x28d   : > { %vm839_vm11 = vcmp.ge.f32.partialorder %v837_v60, 0.0  ;;  %v847_v61 = vmul.f32 %v844_v58, %v837_v60  ;;  %v848_v62 = vsel %vm838_vm10, %v836_v56, %v846_v59 }
 0x28f   : > { %v849_v63 = vsel %vm839_vm11, %v837_v60, %v847_v61 }
 0x290   : > { %v852_v0 = vcombine.low %v848_v62, %v849_v63 }
 0x292   : > { %854 = vst [vmem:[%s490_s1] sm:$0xff] %v852_v0 }
 0x293   : > { %1155 = shalt.err (!%p1152_p7)
}
 0x294   : > { %s1156_s28 = scalar_lea.hbm %s875_s3, 128  ;;  %s1160_s0 = scalar_lea.hbm %s1485_s12, 256 }
 0x295   : > { %p1157_p9 = scmp.ne.s32.totalorder %s875_s3, %s1156_s28  ;;  %p1161_p12 = scmp.lt.s32.totalorder %s875_s3, %s1485_s12 }
 0x296   : > { %p1162_p13 = scmp.lt.s32.totalorder %s1160_s0, %s1156_s28 }
 0x297   : > { %p1158_p10 = pnand %p1157_p9, %p1338_p4 }
 0x298   : > { %p1163_p0 = por %p1162_p13, %p1161_p12 }
 0x299   : > { %p1159_p11 = pneg %p1158_p10 }
 0x29b   : > { %p1164_p1 = pnand %p1163_p0, %p1159_p11 }
 0x29d   : > { %1167 = shalt.err (!%p1164_p1)
}
 0x29e   : > { %1051 = dma.vmem_to_hbm [thread:$0]  (%p1338_p4), %s878_s2, 128, %s875_s3, %s856_s29  }
 0x29f PF: > { %p1062_p2 = scmp.ge.s32.totalorder %s1222_s30, 2  ;;  %s905_s23 = sand.u32 1, %s1202_s25  }
 0x2a0   : > { %s906_s16 = scalar_lea.sflag [#allocation3], %s905_s23 }
 0x2a1   : > { %p1056_p3 = pnand %p1062_p2, %p1345_p8 }
 0x2a3   : > { %p1057_p5 = pneg %p1056_p3 }
 0x2a5   : > { %1193 = dma.done.wait (%p1057_p5), %s906_s16, 128  }
 0x2a6   : > { %1195 = vsyncadd (%p1057_p5), %s906_s16, 4294967168  ;;  %s915_s17 = scalar_lea.sflag [#allocation5], %s905_s23 }
 0x2a7   : > { %1197 = dma.done.wait (%p1057_p5), %s915_s17, 128  }
 0x2a8   : > { %1199 = vsyncadd (%p1057_p5), %s915_s17, 4294967168  ;;  %s30_s30 = sadd.s32 1, %s1222_s30   ;;  %s1506_s18 = sld [smem:[#allocation10_spill]] }
 0x2a9   : > { %p27_p6 = scmp.ge.s32.totalorder %s30_s30, 4   ;;  %s1507_s28 = sld [smem:[#allocation8_spill]] }
 0x2aa   : > { %s1508_s29 = sld [smem:[#allocation9_spill]]  ;;  %s1509_s25 = smov %s1206_s26 }
 0x2ab   : > { %s1510_s26 = smov %s1210_s27  ;;  %29 = sbr.rel (!%p27_p6) target bundleno = 11 (0xb), region = 123 }
 0x2ae   : > { %s1511_s27 = smov %s1506_s18 }
 0x2b0   :  { %920 = vsyncpa [#allocation3], 1 }
 0x2b1   :  { %922 = vsyncpa [#allocation3 + $0x1], 1 }
 0x2b2   :  { %923 = vsyncpa [#allocation5], 1 }
 0x2b3   :  { %925 = vsyncpa [#allocation5 + $0x1], 1 }

</bundles_post_ra>
